<compile_context>
chip_gen: v6e
topology: v6e:2x2x1
jax: 0.10.0
libtpu: 0.0.40
codegen_flags: <defaults>
</compile_context>

<pallas_src>
import functools

import numpy as np
import jax
import jax.numpy as jnp
from jax import lax
from jax.experimental import pallas as pl
from jax.experimental.pallas import tpu as pltpu


# ---------------------------------------------------------------------------
# Kernel 1: exact global lower-median of |x|  ->  writes 1/median to SMEM
# ---------------------------------------------------------------------------
def _inv_median_kernel(x_ref, inv_ref, *, k):
    """x_ref: (rows, lanes) f32 (padding, if any, holds +inf).
    inv_ref: (1, 1) f32 in SMEM, receives 1/median.
    k: 0-based rank of the torch lower median, (n_real - 1) // 2.
    """
    a = jnp.abs(x_ref[...])                          # (rows, lanes) f32, >= 0
    bits = pltpu.bitcast(a, jnp.int32)               # order-preserving for |x|

    def body(i, carry):
        prefix, kk = carry                           # int32 scalars
        b = 30 - i                                   # bit index 30 .. 0
        # Fused bucket test: prefix has bits b..0 clear, so
        #   (high bits match prefix) AND (bit b == 0)  <=>  (bits & keep) == prefix
        low = (jnp.int32(1) << b) - jnp.int32(1)     # bits b-1..0
        keep = ~low                                  # bits 31..b
        cond = (bits & keep) == prefix               # (rows, lanes) bool

        # Two-stage exact count: VALU adds along sublanes, then one small
        # cross-lane reduce (keeps the XLU off the critical path).
        ind = cond.astype(jnp.int32)
        col = jnp.sum(ind, axis=0)                   # (lanes,) int32
        count = jnp.sum(col)                         # scalar int32

        bit = jnp.int32(1) << b
        take_one = kk >= count                       # k-th lives in bit=1 group
        prefix = jnp.where(take_one, prefix | bit, prefix)
        kk = jnp.where(take_one, kk - count, kk)
        return prefix, kk

    prefix, _ = lax.fori_loop(0, 31, body, (jnp.int32(0), jnp.int32(k)))

    # `prefix` now IS the bit pattern of the k-th smallest |x|.
    median = lax.bitcast_convert_type(prefix, jnp.float32)
    inv_ref[0, 0] = jnp.float32(1.0) / median


# ---------------------------------------------------------------------------
# Kernel 2: tiled elementwise normalize  o = x * (1/median)
# ---------------------------------------------------------------------------
def _scale_kernel(inv_ref, x_ref, o_ref):
    o_ref[...] = x_ref[...] * inv_ref[0, 0]


# ---------------------------------------------------------------------------
# Layout helpers
# ---------------------------------------------------------------------------
def _choose_layout(n):
    """Return (rows, lanes) with rows % 8 == 0 and lanes % 128 == 0 such that
    rows * lanes == n (zero-copy reshape), preferring wide (lane-dense) rows.
    Returns None if no such factorization exists."""
    for lanes in (2048, 1024, 512, 256, 128):
        if n % lanes == 0 and (n // lanes) % 8 == 0:
            return n // lanes, lanes
    return None


def _pick_tile_rows(rows, lanes, target_bytes=2 << 20):
    """Largest multiple-of-8 divisor of `rows` whose f32 tile fits target_bytes."""
    r8 = rows // 8
    best = 8
    for d in range(1, r8 + 1):
        tr = 8 * d
        if tr * lanes * 4 > target_bytes:
            break
        if r8 % d == 0:
            best = tr
    return best


# ---------------------------------------------------------------------------
# Wrapper (equivalent of MedianNormalize(dim=None).forward)
# ---------------------------------------------------------------------------
def median_normalize(x, cache=None, dim=None):
    if dim is not None:
        # TODO(synk): the reference dim-branch divides a tensor by a
        # (values, indices) namedtuple and raises in PyTorch; only the
        # dim=None (global median) path is implemented.
        raise NotImplementedError("dim != None is not supported")
    if cache is None:
        cache = jnp.array([], dtype=jnp.float32)

    orig_shape = x.shape
    orig_dtype = x.dtype
    n = int(np.prod(orig_shape))
    k = (n - 1) // 2                      # torch lower-median rank, 0-based

    flat = x.astype(jnp.float32).reshape(-1)

    layout = _choose_layout(n)
    if layout is not None:
        rows, lanes = layout
        tiled = flat.reshape(rows, lanes)             # pure metadata reshape
        padded = False
    else:
        # TODO(synk): ragged sizes still pay one pad + one un-pad HBM copy; a
        # fully copy-free path would mask the tail in-kernel with iota.
        lanes = 128
        rows = -(-n // lanes)
        rows = -(-rows // 8) * 8
        tiled = (jnp.full((rows * lanes,), jnp.inf, jnp.float32)
                 .at[:n].set(flat).reshape(rows, lanes))
        padded = True

    slab_bytes = rows * lanes * 4
    vlim_reduce = int(min(max(4 * slab_bytes + (4 << 20), 32 << 20), 64 << 20))

    # --- pass 1: 1/median scalar -------------------------------------------
    inv = pl.pallas_call(
        functools.partial(_inv_median_kernel, k=k),
        out_shape=jax.ShapeDtypeStruct((1, 1), jnp.float32),
        grid=(1,),
        in_specs=[pl.BlockSpec((rows, lanes), lambda i: (0, 0))],
        out_specs=pl.BlockSpec(memory_space=pltpu.MemorySpace.SMEM),
        compiler_params=pltpu.CompilerParams(
            dimension_semantics=("arbitrary",),
            vmem_limit_bytes=vlim_reduce),
    )(tiled)

    # --- pass 2: tiled, parallel, lane-dense normalize ----------------------
    tile_rows = _pick_tile_rows(rows, lanes)
    tile_bytes = tile_rows * lanes * 4
    vlim_scale = int(min(max(6 * tile_bytes + (4 << 20), 16 << 20), 64 << 20))

    out_tiled = pl.pallas_call(
        _scale_kernel,
        out_shape=jax.ShapeDtypeStruct((rows, lanes), jnp.float32),
        grid=(rows // tile_rows,),
        in_specs=[pl.BlockSpec(memory_space=pltpu.MemorySpace.SMEM),
                  pl.BlockSpec((tile_rows, lanes), lambda i: (i, 0))],
        out_specs=pl.BlockSpec((tile_rows, lanes), lambda i: (i, 0)),
        compiler_params=pltpu.CompilerParams(
            dimension_semantics=("parallel",),
            vmem_limit_bytes=vlim_scale),
    )(inv, tiled)

    out = out_tiled.reshape(-1)
    if padded:
        out = out[:n]
    out = out.reshape(orig_shape).astype(orig_dtype)
    return out, cache


if __name__ == "__main__":
    key = jax.random.PRNGKey(0)
    x = jax.random.normal(key, (2, 4, 16, 16), dtype=jnp.float32)

    out, cache = median_normalize(x)
    out = jax.block_until_ready(out)

    # Reference check (numpy): torch.median returns the lower of the two
    # middle values for an even element count.
    x_np = np.asarray(x)
    med_ref = np.sort(np.abs(x_np).ravel())[(x_np.size - 1) // 2]
    ref = x_np / med_ref
    np.testing.assert_allclose(np.asarray(out), ref, rtol=1e-6, atol=1e-6)

    print("KERNEL_OK")
</pallas_src>

<mosaic_0001>
module attributes {stable_mosaic.version = 11 : i64} {
  func.func @_inv_median_kernel(%arg0: i32, %arg1: memref<8x256xf32, #tpu.memory_space<vmem>>, %arg2: memref<1x1xf32, #tpu.memory_space<smem>>) attributes {dimension_semantics = [#tpu.dimension_semantics<arbitrary>], iteration_bounds = array<i64: 1>, scalar_prefetch = 0 : i64, scratch_operands = 0 : i64, tpu.core_type = #tpu.core_type<tc>, window_params = [{pipeline_mode = #tpu.pipeline_mode<synchronous>, transform_indices = @transform_0, window_bounds = array<i64: 8, 256>}, {transform_indices = @transform_1, window_bounds = array<i64: 1, 1>}]} {
    %c0 = arith.constant 0 : index
    %c0_0 = arith.constant 0 : index
    %0 = vector.load %arg1[%c0, %c0_0] : memref<8x256xf32, #tpu.memory_space<vmem>>, vector<8x256xf32>
    %1 = math.absf %0 : vector<8x256xf32>
    %2 = tpu.bitcast %1 : vector<8x256xf32> -> vector<8x256xi32>
    %c0_i32 = arith.constant 0 : i32
    %c1023_i32 = arith.constant 1023 : i32
    %c0_i32_1 = arith.constant 0 : i32
    %c31_i32 = arith.constant 31 : i32
    %3 = arith.addi %c0_i32_1, %c31_i32 : i32
    %c1_i32 = arith.constant 1 : i32
    %4:2 = scf.for %arg3 = %c0_i32_1 to %3 step %c1_i32 iter_args(%arg4 = %c0_i32, %arg5 = %c1023_i32) -> (i32, i32)  : i32 {
      %c30_i32 = arith.constant 30 : i32
      %8 = arith.subi %c30_i32, %arg3 : i32
      %c1_i32_5 = arith.constant 1 : i32
      %9 = arith.shli %c1_i32_5, %8 : i32
      %c1_i32_6 = arith.constant 1 : i32
      %10 = arith.subi %9, %c1_i32_6 : i32
      %c-1_i32 = arith.constant -1 : i32
      %11 = arith.xori %10, %c-1_i32 : i32
      %12 = vector.broadcast %11 : i32 to vector<8x256xi32>
      %13 = arith.andi %2, %12 : vector<8x256xi32>
      %14 = vector.broadcast %arg4 : i32 to vector<8x256xi32>
      %15 = arith.cmpi eq, %13, %14 : vector<8x256xi32>
      %16 = arith.extui %15 : vector<8x256xi1> to vector<8x256xi32>
      %cst_7 = arith.constant dense<0> : vector<256xi32>
      %17 = vector.multi_reduction <add>, %16, %cst_7 [0] : vector<8x256xi32> to vector<256xi32>
      %18 = vector.shape_cast %17 : vector<256xi32> to vector<1x256xi32>
      %cst_8 = arith.constant dense<0> : vector<1xi32>
      %19 = vector.multi_reduction <add>, %18, %cst_8 [1] : vector<1x256xi32> to vector<1xi32>
      %20 = vector.shape_cast %19 : vector<1xi32> to vector<1x1xi32>
      %21 = vector.extract %20[0, 0] : i32 from vector<1x1xi32>
      %c1_i32_9 = arith.constant 1 : i32
      %22 = arith.shli %c1_i32_9, %8 : i32
      %23 = arith.cmpi sge, %arg5, %21 : i32
      %24 = arith.ori %arg4, %22 : i32
      %25 = arith.select %23, %24, %arg4 : i32
      %26 = arith.subi %arg5, %21 : i32
      %27 = arith.select %23, %26, %arg5 : i32
      scf.yield %25, %27 : i32, i32
    }
    %c31_i32_2 = arith.constant 31 : i32
    %5 = arith.bitcast %4#0 : i32 to f32
    %cst = arith.constant 1.000000e+00 : f32
    %6 = arith.divf %cst, %5 : f32
    %c0_3 = arith.constant 0 : index
    %c0_4 = arith.constant 0 : index
    %7 = memref.load %arg2[%c0_3, %c0_4] : memref<1x1xf32, #tpu.memory_space<smem>>
    memref.store %6, %arg2[%c0_3, %c0_4] : memref<1x1xf32, #tpu.memory_space<smem>>
    return
  }
  func.func @transform_0(%arg0: i32) -> (i32, i32) {
    %c0_i32 = arith.constant 0 : i32
    %c0_i32_0 = arith.constant 0 : i32
    %c0_i32_1 = arith.constant 0 : i32
    return %c0_i32, %c0_i32_0 : i32, i32
  }
  func.func @transform_1(%arg0: i32) -> (i32, i32) {
    %c0_i32 = arith.constant 0 : i32
    %c0_i32_0 = arith.constant 0 : i32
    %c0_i32_1 = arith.constant 0 : i32
    return %c0_i32, %c0_i32_0 : i32, i32
  }
}

</mosaic_0001>

<bundles_post_ra>
// kernel: tpu_custom_call.1
= control target key start
LH: loop header
LB: loop body
LE: loop exit
PB: predicated region body
PF: predicated region fallthrough
CT: control target
= control target key end

     0   :  { %6 = vsyncpa [#allocation3], 0  ;;  %s256_s0 = inlined_call_operand.hbm [shape: f32[8,256], index: 0, kind: input, shape index: {}]   ;;  %s257_s1 = inlined_call_operand.hbm [shape: f32[1,1], index: 1, kind: output, shape index: {}]  }
   0x1   :  { %7 = vsyncpa [#allocation4], 0  ;;  %s200_s6 = smov [#allocation2]  }
   0x2   :  { %s14_s7 = sshll.u32 %s200_s6, 4  ;;  %s15_s7 = int_to_ptr.vmem [resolvable:$true] %s14_s7 }
   0x3   :  { %s152_s8 = scalar_lea.vmem %s15_s7, 256  ;;  %p157_p1 = scmp.lt.s32.totalorder %s15_s7, %s15_s7 }
   0x4   :  { %p153_p0 = scmp.ne.s32.totalorder %s15_s7, %s152_s8  ;;  %p158_p2 = scmp.lt.s32.totalorder %s152_s8, %s152_s8 }
   0x6   :  { %p159_p3 = por %p158_p2, %p157_p1 }
   0x8   :  { %p160_p4 = pnand %p159_p3, %p153_p0 }
   0xa   :  { %163 = shalt.err (!%p160_p4)
}
   0xb   :  { %17 = dma.hbm_to_vmem [thread:$0]  %s256_s0, 256, %s15_s7, [#allocation3]  }
   0xc   :  { %184 = dma.done.wait [#allocation3], 256  }
   0xd   :  { %185 = vsyncadd [#allocation3], 4294967040  ;;  %v217_v0 = vld [vmem:[#allocation2] sm:$0xff]  ;;  %v22_v1 = vld [vmem:[#allocation2 + $0x8] sm:$0xff]  ;;  %s220_s11 = smov 1023   ;;  %s222_s12 = smov 0  }
   0xe   :  { %v23_v2 = vand.u32 2147483647, %v217_v0  ;;  %v24_v3 = vand.u32 2147483647, %v22_v1  ;;  %s224_s13 = smov 0  }
   0xf LB: > { %s35_s0 = ssub.s32 30, %s198_s13  ;;  %s201_s14 = smov 1   ;;  %v42_v5 = vstv %s194_s12  ;;  %v202_v8 = vmov 0   ;;  %s198_s13 = sphi %s224_s13, %s32_s13   ;;  %s194_s12 = sphi %s222_s12, %s259_s12   ;;  %s190_s11 = sphi %s220_s11, %s258_s11  }
  0x10   : > { %s236_s15 = sshll.u32 %s201_s14, %s35_s0  ;;  %s32_s13 = sadd.s32 1, %s198_s13  }
  0x11   : > { %s109_s16 = sadd.s32 4294967295, %s236_s15  ;;  %s74_s19 = sor.u32 %s194_s12, %s236_s15 }
  0x12   : > { %s38_s17 = sxor.u32 4294967295, %s109_s16  ;;  %p29_p6 = scmp.ge.s32.totalorder %s32_s13, 31  }
  0x13   : > { %v39_v4 = vstv %s38_s17  ;;  %s203_s22 = smov (%p29_p6), [#allocation5]  }
  0x14   : > { %v40_v6 = vand.u32 %v39_v4, %v23_v2  ;;  %v41_v7 = vand.u32 %v39_v4, %v24_v3 }
  0x16   : > { %vm43_vm0 = vcmp.eq.s32.totalorder %v40_v6, %v42_v5  ;;  %vm44_vm1 = vcmp.eq.s32.totalorder %v41_v7, %v42_v5 }
  0x17   : > { %v45_v9 = vsel %vm43_vm0, 1, %v202_v8  ;;  %v46_v10 = vsel %vm44_vm1, 1, %v202_v8 }
  0x18   : > { %v47_v11 = vrot.slane %v45_v9, 4  ;;  %v53_v12 = vrot.slane %v46_v10, 4 }
  0x1a   : > { %v48_v13 = vadd.s32 %v47_v11, %v45_v9  ;;  %v54_v14 = vadd.s32 %v53_v12, %v46_v10 }
  0x1c   : > { %v49_v15 = vrot.slane %v48_v13, 2  ;;  %v55_v16 = vrot.slane %v54_v14, 2 }
  0x1e   : > { %v50_v17 = vadd.s32 %v49_v15, %v48_v13  ;;  %v56_v18 = vadd.s32 %v55_v16, %v54_v14 }
  0x20   : > { %v51_v19 = vrot.slane %v50_v17, 1  ;;  %v57_v20 = vrot.slane %v56_v18, 1 }
  0x22   : > { %v52_v21 = vadd.s32 %v51_v19, %v50_v17  ;;  %v58_v22 = vadd.s32 %v57_v20, %v56_v18 }
  0x24   : > { %v59_v23 = vadd.s32 %v58_v22, %v52_v21 }
  0x26   : > { %v61_v24 = vshrl.u32 %v59_v23, 16  ;;  %v60_v25 = vand.u32 65535, %v59_v23 }
  0x28   : > { %v63_v26 = vcvt.s32.f32 %v61_v24  ;;  %v62_v27 = vcvt.s32.f32 %v60_v25 }
  0x2a   : > { %66 = vadd.xlane.f32.xlu0 %v63_v26 }
  0x2e   : > { %64 = vadd.xlane.f32.xlu0 %v62_v27 }
  0xb3   : > { %v67_v28 = vpop.xlane.xlu0 %66 }
  0xb4   : > { %v69_v29 = vcvt.f32.s32 %v67_v28 }
  0xb6   : > { %v70_v31 = vshll.u32 %v69_v29, 16 }
  0xb7   : > { %v65_v30 = vpop.xlane.xlu0 %64 }
  0xb8   : > { %v68_v32 = vcvt.f32.s32 %v65_v30 }
  0xba   : > { %v71_v33 = vadd.s32 %v70_v31, %v68_v32 }
  0xbc   : > { %110 = vpush %v71_v33 }
  0xed   : > { %s111_s18 = spop %110  ;;  %31 = sbr.rel (!%p29_p6) target bundleno = 15 (0xf), region = 36 }
  0xee   : > { %p73_p5 = scmp.ge.s32.totalorder %s190_s11, %s111_s18  ;;  %s76_s20 = ssub.s32 %s190_s11, %s111_s18 }
  0xf0   : > { %s261_s19 = smov (!%p73_p5, %s74_s19), %s194_s12  ;;  %s263_s20 = smov (!%p73_p5, %s76_s20), %s190_s11 }
  0xf1   : > { %s258_s11 = smov %s263_s20  ;;  %s259_s12 = smov %s261_s19  ;;  %v79_v34 = vstv (%p29_p6), %s261_s19 }
  0xf2   :  { %142 = vrcp.f32 %v79_v34 }
  0xff   :  { %v143_v35 = vpop.eup %142 }
 0x100   :  { %112 = vpush %v143_v35 }
 0x131   :  { %s113_s21 = spop %112 }
 0x132   :  { %83 = sst [smem:[#allocation5]] %s113_s21 }
 0x133   :  { %91 = dma.smem_to_hbm %s203_s22, 16, %s257_s1, [#allocation4]  }
 0x134   :  { %186 = dma.done.wait [#allocation4], 16  }
 0x135   :  { %187 = vsyncadd [#allocation4], 4294967280 }
 0x136   :  { %95 = sfence }
 0x137   :  { %96 = vsyncpa [#allocation3], 1 }
 0x138   :  { %97 = vsyncpa [#allocation4], 1 }

</bundles_post_ra>
